<compile_context>
chip_gen: v5e
topology: v5e:2x2
jax: 0.10.0
libtpu: 0.0.40
codegen_flags: <defaults>
</compile_context>

<pallas_src>
import jax
import jax.numpy as jnp
from jax.experimental import pallas as pl
from jax.experimental.pallas import tpu as pltpu


def logreg_kernel(x_ref, w_ref, b_ref, o_ref):
    # x: (TILE_N, F) VMEM tile, w: (1, F) VMEM (grid-invariant), b: (1,) SMEM.
    x = x_ref[...]
    w = w_ref[...]                                   # broadcasts over rows
    # VPU elementwise multiply + XLU cross-lane row reduction (no MXU needed
    # for an output width of 1).
    z = jnp.sum(x * w, axis=-1, keepdims=True) + b_ref[0]
    # Exact sigmoid; exp issues on the otherwise-idle EUP slot.
    o_ref[...] = (1.0 / (1.0 + jnp.exp(-z))).astype(o_ref.dtype)


def logistic_regression(x, w, b, *, tile_n=None):
    """x: [N, F] f32, w: [1, F] f32 (PyTorch nn.Linear weight layout), b: [1] f32 -> [N, 1] f32."""
    N, F = x.shape
    assert w.shape == (1, F), w.shape
    assert b.shape == (1,), b.shape

    if tile_n is None:
        # Keep each x buffer <= ~2 MiB and <= 2048 rows so that the
        # double-buffered pipeline fits comfortably even in v7x's 64 MiB VMEM.
        rows_by_vmem = max(8, ((2 * 1024 * 1024) // (F * 4)) // 8 * 8)
        tile_n = min(N, 2048, rows_by_vmem)
    tile_n = min(tile_n, N)

    grid = (pl.cdiv(N, tile_n),)

    return pl.pallas_call(
        logreg_kernel,
        out_shape=jax.ShapeDtypeStruct((N, 1), jnp.float32),
        grid_spec=pltpu.PrefetchScalarGridSpec(
            num_scalar_prefetch=0,
            grid=grid,
            in_specs=[
                # Batch-tiled, double-buffered activation stream.
                pl.BlockSpec((tile_n, F), lambda i: (i, 0)),
                # Weight: constant block index -> VMEM-resident across grid.
                pl.BlockSpec((1, F), lambda i: (0, 0)),
                # Bias: scalar in SMEM.
                pl.BlockSpec(memory_space=pltpu.MemorySpace.SMEM),
            ],
            out_specs=pl.BlockSpec((tile_n, 1), lambda i: (i, 0)),
        ),
        compiler_params=pltpu.CompilerParams(
            # Independent batch tiles -> megacore-parallel on v7x.
            dimension_semantics=("parallel",),
            vmem_limit_bytes=32 * 1024 * 1024,
        ),
    )(x, w, b)


if __name__ == "__main__":
    key = jax.random.PRNGKey(0)
    k_x, k_w, k_b = jax.random.split(key, 3)

    batch = 8
    n_input_features = 32

    # Deterministic synthetic inputs mimicking nn.Linear(F, 1) parameter shapes.
    x = jax.random.normal(k_x, (batch, n_input_features), dtype=jnp.float32)
    w = jax.random.normal(k_w, (1, n_input_features), dtype=jnp.float32) * 0.1
    b = jax.random.normal(k_b, (1,), dtype=jnp.float32) * 0.1

    y_pred = logistic_regression(x, w, b)
    jax.block_until_ready(y_pred)

    # Sanity-check against plain-JAX reference of the PyTorch forward.
    y_ref = jax.nn.sigmoid(x @ w.T + b[0])
    assert y_pred.shape == (batch, 1)
    assert jnp.allclose(y_pred, y_ref, atol=1e-5, rtol=1e-5)

    print("KERNEL_OK")
</pallas_src>

<mosaic_0001>
module attributes {stable_mosaic.version = 11 : i64} {
  func.func @logreg_kernel(%arg0: i32, %arg1: memref<8x32xf32, #tpu.memory_space<vmem>>, %arg2: memref<1x32xf32, #tpu.memory_space<vmem>>, %arg3: memref<1xf32, #tpu.memory_space<smem>>, %arg4: memref<8x1xf32, #tpu.memory_space<vmem>>) attributes {dimension_semantics = [#tpu.dimension_semantics<parallel>], iteration_bounds = array<i64: 1>, scalar_prefetch = 0 : i64, scratch_operands = 0 : i64, tpu.core_type = #tpu.core_type<tc>, window_params = [{transform_indices = @transform_0, window_bounds = array<i64: 8, 32>}, {pipeline_mode = #tpu.pipeline_mode<synchronous>, transform_indices = @transform_1, window_bounds = array<i64: 1, 32>}, {transform_indices = @transform_2, window_bounds = array<i64: 1>}, {transform_indices = @transform_3, window_bounds = array<i64: 8, 1>}]} {
    %c0 = arith.constant 0 : index
    %c0_0 = arith.constant 0 : index
    %0 = vector.load %arg1[%c0, %c0_0] : memref<8x32xf32, #tpu.memory_space<vmem>>, vector<8x32xf32>
    %c0_1 = arith.constant 0 : index
    %c0_2 = arith.constant 0 : index
    %1 = vector.load %arg2[%c0_1, %c0_2] : memref<1x32xf32, #tpu.memory_space<vmem>>, vector<1x32xf32>
    %2 = vector.broadcast %1 : vector<1x32xf32> to vector<8x32xf32>
    %3 = arith.mulf %0, %2 : vector<8x32xf32>
    %cst = arith.constant dense<0.000000e+00> : vector<8xf32>
    %4 = vector.multi_reduction <add>, %3, %cst [1] : vector<8x32xf32> to vector<8xf32>
    %5 = vector.shape_cast %4 : vector<8xf32> to vector<8x1xf32>
    %c0_3 = arith.constant 0 : index
    %6 = memref.load %arg3[%c0_3] : memref<1xf32, #tpu.memory_space<smem>>
    %7 = vector.broadcast %6 : f32 to vector<8x1xf32>
    %8 = arith.addf %5, %7 : vector<8x1xf32>
    %cst_4 = arith.constant 0.000000e+00 : f32
    %9 = vector.broadcast %cst_4 : f32 to vector<8x1xf32>
    %10 = arith.subf %9, %8 : vector<8x1xf32>
    %11 = math.exp %10 : vector<8x1xf32>
    %cst_5 = arith.constant 1.000000e+00 : f32
    %12 = vector.broadcast %cst_5 : f32 to vector<8x1xf32>
    %13 = arith.addf %12, %11 : vector<8x1xf32>
    %cst_6 = arith.constant 1.000000e+00 : f32
    %14 = vector.broadcast %cst_6 : f32 to vector<8x1xf32>
    %15 = arith.divf %14, %13 : vector<8x1xf32>
    %c0_7 = arith.constant 0 : index
    %c0_8 = arith.constant 0 : index
    %16 = vector.load %arg4[%c0_7, %c0_8] : memref<8x1xf32, #tpu.memory_space<vmem>>, vector<8x1xf32>
    tpu.vector_store %arg4[%c0_7, %c0_8], %15 {strides = array<i32>} : memref<8x1xf32, #tpu.memory_space<vmem>>, vector<8x1xf32>,
    return
  }
  func.func @transform_0(%arg0: i32) -> (i32, i32) {
    %c0_i32 = arith.constant 0 : i32
    %c0_i32_0 = arith.constant 0 : i32
    return %arg0, %c0_i32 : i32, i32
  }
  func.func @transform_1(%arg0: i32) -> (i32, i32) {
    %c0_i32 = arith.constant 0 : i32
    %c0_i32_0 = arith.constant 0 : i32
    %c0_i32_1 = arith.constant 0 : i32
    return %c0_i32, %c0_i32_0 : i32, i32
  }
  func.func @transform_2(%arg0: i32) -> i32 {
    %c0_i32 = arith.constant 0 : i32
    %c0_i32_0 = arith.constant 0 : i32
    return %c0_i32 : i32
  }
  func.func @transform_3(%arg0: i32) -> (i32, i32) {
    %c0_i32 = arith.constant 0 : i32
    %c0_i32_0 = arith.constant 0 : i32
    return %arg0, %c0_i32 : i32, i32
  }
}

</mosaic_0001>

<bundles_post_ra>
// kernel: tpu_custom_call.1
= control target key start
LH: loop header
LB: loop body
LE: loop exit
PB: predicated region body
PF: predicated region fallthrough
CT: control target
= control target key end

     0   :  { %9 = vsyncpa [#allocation4], 0  ;;  %s100_s15 = smov [#allocation3]   ;;  %s133_s0 = inlined_call_operand.hbm [shape: f32[8,32], index: 0, kind: input, shape index: {}]   ;;  %s134_s1 = inlined_call_operand.vmem [shape: f32[1,32], index: 1, kind: input, shape index: {}]   ;;  %s135_s2 = inlined_call_operand.<no memory space> [shape: f32[1], index: 2, kind: input, shape index: {}]   ;;  %s136_s3 = inlined_call_operand.vmem [shape: f32[8,1], index: 3, kind: output, shape index: {}]  }
   0x1   :  { %s15_s14 = sshll.u32 %s133_s0, 4  ;;  %s17_s16 = sshll.u32 %s100_s15, 4  ;;  %s16_s14 = int_to_ptr.hbm [resolvable:$true] %s15_s14  ;;  %s18_s16 = int_to_ptr.vmem [resolvable:$true] %s17_s16 }
   0x2   :  { %20 = dma.hbm_to_vmem [thread:$0]  %s16_s14, 128, %s18_s16, [#allocation4]  }
   0x3   :  { %98 = dma.done.wait [#allocation4], 128  }
   0x4   :  { %99 = vsyncadd [#allocation4], 4294967168  ;;  %v29_v0 = vld [vmem:[#allocation3] sm:$0xff]  ;;  %vm35_vm0 = vcmask 261120   ;;  %v40_v4 = vstv %s135_s2  ;;  %vm61_vm4 = vcmask 7168  }
   0x5   :  { %v69_v1 = vld [vmem:[%s134_s1] ss:$0 sm:$0xff] }
   0x6   :  { %v34_v2 = vmul.f32 %v69_v1, %v29_v0 }
   0x8   :  { %v36_v3 = vsel %vm35_vm0, %v34_v2, 0.0 }
   0x9   :  { %37 = vadd.xlane.f32.xlu0 %v36_v3 }
  0x7c   :  { %v38_v5 = vpop.xlane.xlu0 %37 }
  0x7d   :  { %v41_v6 = vadd.f32 %v40_v4, %v38_v5 }
  0x7f   :  { %v42_v7 = vsub.f32 0.0, %v41_v6 }
  0x81   :  { %v43_v8 = vmul.f32 1.442695, %v42_v7 }
  0x83   :  { %70 = vpow2.f32 %v43_v8 }
  0x89   :  { %v71_v9 = vpop.eup %70 }
  0x8a   :  { %v45_v10 = vadd.f32 1.0, %v71_v9 }
  0x8c   :  { %72 = vrcp.f32 %v45_v10  ;;  %v57_v14 = vand.u32 2147483648, %v45_v10  ;;  %v55_v16 = vand.u32 2147483647, %v45_v10  ;;  %vm51_vm2 = vweird.f32 %v45_v10 }
  0x8e   :  { %v58_v18 = vor.u32 1.1754944e-38, %v57_v14  ;;  %vm56_vm5 = vcmp.eq.f32.partialorder %v55_v16, 8.507059e+37 }
  0x92   :  { %v73_v11 = vpop.eup %72 }
  0x93   :  { %v47_v12 = vmul.f32 %v73_v11, %v45_v10  ;;  %vm52_vm1 = vweird.f32 %v73_v11 }
  0x94   :  { %vm53_vm3 = vmor %vm51_vm2, %vm52_vm1 }
  0x95   :  { %v48_v13 = vsub.f32 1.0, %v47_v12 }
  0x97   :  { %v49_v15 = vmul.f32 %v73_v11, %v48_v13 }
  0x99   :  { %v50_v17 = vadd.f32 %v73_v11, %v49_v15 }
  0x9b   :  { %v54_v19 = vsel %vm53_vm3, %v73_v11, %v50_v17 }
  0x9c   :  { %v59_v20 = vsel %vm56_vm5, %v58_v18, %v54_v19 }
  0x9d   :  { %62 = vst.msk [vmem:[%s136_s3] sm:$0xff] %vm61_vm4, %v59_v20 }
  0x9e   :  { %67 = vsyncpa [#allocation4], 1 }

</bundles_post_ra>
